<compile_context>
chip_gen: v7x
topology: tpu7x:2x2x1
jax: 0.10.0
libtpu: 0.0.40
codegen_flags: <defaults>
</compile_context>

<pallas_src>
import functools

import jax
import jax.numpy as jnp
from jax.experimental import pallas as pl
from jax.experimental.pallas import tpu as pltpu

_MIB = 2 ** 20
_LANE = 128
_MXU_TM_FLOOR = 256      # v6e/v7x MXU is 2x256^2; don't go below this for big M


def _cdiv(a, b):
    return -(-a // b)


def _round_up(v, m):
    return ((v + m - 1) // m) * m


def _sigmoid(r):
    # sigmoid(r) = 0.5*tanh(0.5*r) + 0.5: one EUP push (tanh) instead of
    # exp + reciprocal; the mul/add ride the VPU slot.  Exact sigmoid.
    return 0.5 * jnp.tanh(0.5 * r) + 0.5


def _vmem_capacity_bytes():
    # Physical VMEM of the current generation (128 MiB v5e/v6e, 64 MiB v7x).
    try:
        cap = getattr(pltpu.get_tpu_info(), "vmem_capacity_bytes", None)
        if cap:
            return int(cap)
    except Exception:
        pass
    return 64 * _MIB     # conservative fallback (v7x per-core VMEM)


# ---------------------------------------------------------------------------
# kernels
# ---------------------------------------------------------------------------

def _glu_kernel_fused(x_ref, w_ref, b_ref, o_ref, *, n_out, compute_dtype):
    # One (tm, K) x (K, 2N) MXU matmul; lane-aligned split of the f32
    # accumulator into the left value and the right (gate) pre-activation.
    x = x_ref[...]
    if compute_dtype is not None:
        x = x.astype(compute_dtype)      # in-kernel cast: no wrapper-side pass
    y = jnp.dot(x, w_ref[...], preferred_element_type=jnp.float32) + b_ref[...]
    left = y[:, :n_out]
    right = y[:, n_out:]
    o_ref[...] = (left * _sigmoid(right)).astype(o_ref.dtype)


def _glu_kernel_split(x_ref, wl_ref, bl_ref, wr_ref, br_ref, o_ref, *,
                      compute_dtype):
    # Two MXU dots (N not lane-aligned, or the fused weights would not fit).
    x = x_ref[...]
    if compute_dtype is not None:
        x = x.astype(compute_dtype)
    left = jnp.dot(x, wl_ref[...], preferred_element_type=jnp.float32) + bl_ref[...]
    right = jnp.dot(x, wr_ref[...], preferred_element_type=jnp.float32) + br_ref[...]
    o_ref[...] = (left * _sigmoid(right)).astype(o_ref.dtype)


# ---------------------------------------------------------------------------
# parameter prep (one-time, hoisted out of the per-call path)
# ---------------------------------------------------------------------------

def glu_prepare_params(w_left, b_left, w_right, b_right, *, compute_dtype=None):
    """w_left / w_right: (K, N) (transposed vs. PyTorch nn.Linear.weight).
    b_left / b_right: (N,).
    compute_dtype: optional MXU operand dtype (e.g. jnp.bfloat16 on v6e/v7x);
    weights are cast once here, x is cast inside the kernel, accumulation and
    the gate math stay in f32."""
    K, N = w_left.shape
    wl = w_left if compute_dtype is None else w_left.astype(compute_dtype)
    wr = w_right if compute_dtype is None else w_right.astype(compute_dtype)
    bl = b_left.astype(jnp.float32).reshape(1, N)
    br = b_right.astype(jnp.float32).reshape(1, N)
    params = dict(K=K, N=N, compute_dtype=compute_dtype,
                  w_left=wl, b_left=bl, w_right=wr, b_right=br,
                  w_fused=None, b_fused=None)
    if N % _LANE == 0:
        # Lane-aligned split point -> the single-matmul fused path is legal.
        params["w_fused"] = jnp.concatenate([wl, wr], axis=1)    # (K, 2N)
        params["b_fused"] = jnp.concatenate([bl, br], axis=1)    # (1, 2N)
    return params


# ---------------------------------------------------------------------------
# forward
# ---------------------------------------------------------------------------

def glu_forward(x, params, *, tile_m=512, tile_n=512):
    """GLU forward.  x: (..., K).  Returns (..., N) in x's dtype."""
    K, N = params["K"], params["N"]
    compute_dtype = params["compute_dtype"]
    out_dtype = x.dtype
    orig_shape = x.shape

    x2d = x.reshape(-1, K)
    M = x2d.shape[0]

    elt_x = jnp.dtype(x2d.dtype).itemsize
    elt_w = jnp.dtype(params["w_left"].dtype).itemsize
    elt_o = jnp.dtype(out_dtype).itemsize

    cap = _vmem_capacity_bytes()
    budget = (cap * 3) // 4                          # headroom for Mosaic scratch
    vmem_limit = int(min(cap - 4 * _MIB, 120 * _MIB))

    # ---- row tile ---------------------------------------------------------
    tile_m = max(_MXU_TM_FLOOR, (tile_m // _MXU_TM_FLOOR) * _MXU_TM_FLOOR)
    tm = M if M <= tile_m else tile_m                # full dim, or mult of 256
    # v7x has 2 TensorCores: give the "parallel" row axis >= 2 steps when
    # there is enough work for both cores.
    if M >= 2 * _MXU_TM_FLOOR and _cdiv(M, tm) < 2:
        tm = _round_up(_cdiv(M, 2), 8)
    tm_floor = min(tm, _MXU_TM_FLOOR)

    # ---- fused single-matmul path (N lane-aligned, weights fit VMEM) -------
    def est_fused(tm_):
        return (2 * tm_ * K * elt_x                  # x tile (double-buffered)
                + K * 2 * N * elt_w + 2 * N * 4      # fused W + bias (single-buf)
                + 2 * tm_ * N * elt_o                # out tile (double-buffered)
                + 3 * tm_ * N * 4)                   # in-kernel f32 y + temps

    fused = params["w_fused"] is not None
    if fused:
        tmf = tm
        while tmf > tm_floor and est_fused(tmf) > budget:
            tmf = max(tm_floor, tmf // 2)
        fused = est_fused(tmf) <= budget             # else: column-tiled path
        if fused:
            tm = tmf

    if fused:
        n_m = _cdiv(M, tm)                           # ragged tail masked

        def build(single_buffer):
            def const_spec(shape):
                if single_buffer:
                    # index never changes -> double-buffering is pure waste
                    return pl.BlockSpec(shape, lambda i: (0, 0),
                                        pipeline_mode=pl.Buffered(1))
                return pl.BlockSpec(shape, lambda i: (0, 0))

            in_specs = [
                pl.BlockSpec((tm, K), lambda i: (i, 0)),   # x rows (streamed)
                const_spec((K, 2 * N)),                    # fused weights
                const_spec((1, 2 * N)),                    # fused bias
            ]
            out_specs = pl.BlockSpec((tm, N), lambda i: (i, 0))
            kernel = functools.partial(_glu_kernel_fused, n_out=N,
                                       compute_dtype=compute_dtype)
            operands = (x2d, params["w_fused"], params["b_fused"])
            return kernel, (n_m,), in_specs, out_specs, ("parallel",), operands
    else:
        # ---- split / column-tiled path --------------------------------------
        if N <= tile_n or N < _LANE:
            tn = N
        else:
            tn = max(_LANE, (tile_n // _LANE) * _LANE)

        def est_split(tm_, tn_):
            return (2 * tm_ * K * elt_x
                    + 2 * 2 * (K * tn_ * elt_w + tn_ * 4)   # both gates
                    + 2 * tm_ * tn_ * elt_o
                    + 3 * tm_ * tn_ * 4)                    # f32 intermediates

        # Prefer shrinking tn (lane multiples), then tm; never below floors.
        while est_split(tm, tn) > budget and tn > _LANE and tn % _LANE == 0:
            tn = max(_LANE, _round_up(tn // 2, _LANE))
        while est_split(tm, tn) > budget and tm > tm_floor:
            tm = max(tm_floor, tm // 2)

        n_m, n_n = _cdiv(M, tm), _cdiv(N, tn)
        # Re-stream the SMALLER operand: if x (M*K) is smaller than the weight
        # pair (2*K*N), put M innermost so each weight slab is DMA'd exactly
        # once; otherwise put N innermost so x is DMA'd exactly once.
        inner_m = M * K * elt_x <= 2 * K * N * elt_w

        wl, bl = params["w_left"], params["b_left"]
        wr, br = params["w_right"], params["b_right"]

        def build(single_buffer):
            def spec(shape, imap, const_inner):
                if single_buffer and const_inner:
                    return pl.BlockSpec(shape, imap,
                                        pipeline_mode=pl.Buffered(1))
                return pl.BlockSpec(shape, imap)

            if inner_m:
                grid = (n_n, n_m)                    # M innermost
                in_specs = [
                    spec((tm, K), lambda j, i: (i, 0), False),   # x (streamed)
                    spec((K, tn), lambda j, i: (0, j), True),    # W_left slab
                    spec((1, tn), lambda j, i: (0, j), True),    # b_left
                    spec((K, tn), lambda j, i: (0, j), True),    # W_right slab
                    spec((1, tn), lambda j, i: (0, j), True),    # b_right
                ]
                out_specs = pl.BlockSpec((tm, tn), lambda j, i: (i, j))
            else:
                grid = (n_m, n_n)                    # N innermost
                in_specs = [
                    spec((tm, K), lambda i, j: (i, 0), True),    # x (resident)
                    spec((K, tn), lambda i, j: (0, j), False),   # W_left slab
                    spec((1, tn), lambda i, j: (0, j), False),   # b_left
                    spec((K, tn), lambda i, j: (0, j), False),   # W_right slab
                    spec((1, tn), lambda i, j: (0, j), False),   # b_right
                ]
                out_specs = pl.BlockSpec((tm, tn), lambda i, j: (i, j))
            kernel = functools.partial(_glu_kernel_split,
                                       compute_dtype=compute_dtype)
            operands = (x2d, wl, bl, wr, br)
            return (kernel, grid, in_specs, out_specs,
                    ("parallel", "parallel"), operands)

    def run(single_buffer):
        kernel, grid, in_specs, out_specs, dims, operands = build(single_buffer)
        return pl.pallas_call(
            kernel,
            out_shape=jax.ShapeDtypeStruct((M, N), out_dtype),
            grid_spec=pltpu.PrefetchScalarGridSpec(
                num_scalar_prefetch=0,
                grid=grid,
                in_specs=in_specs,
                out_specs=out_specs,
            ),
            compiler_params=pltpu.CompilerParams(
                dimension_semantics=dims,
                vmem_limit_bytes=vmem_limit,
            ),
        )(*operands)

    try:
        out = run(single_buffer=True)
    except Exception:
        # pipeline_mode=pl.Buffered(1) unsupported on this JAX build, or the
        # single-buffered schedule was rejected: retry with default specs.
        out = run(single_buffer=False)

    return out.reshape(orig_shape[:-1] + (N,))


def _reference(x, w_left, b_left, w_right, b_right):
    left = x @ w_left + b_left
    right = x @ w_right + b_right
    return left * jax.nn.sigmoid(right)


if __name__ == "__main__":
    key = jax.random.PRNGKey(0)
    kx, kwl, kbl, kwr, kbr, kx2 = jax.random.split(key, 6)

    def make_params(K, N):
        # nn.Linear default init: U(-1/sqrt(K), 1/sqrt(K)).
        bound = 1.0 / (K ** 0.5)
        w_l = jax.random.uniform(kwl, (K, N), jnp.float32, -bound, bound)
        b_l = jax.random.uniform(kbl, (N,), jnp.float32, -bound, bound)
        w_r = jax.random.uniform(kwr, (K, N), jnp.float32, -bound, bound)
        b_r = jax.random.uniform(kbr, (N,), jnp.float32, -bound, bound)
        return w_l, b_l, w_r, b_r

    # Case 1: split path (N = 32 < 128 -> two MXU dots), f32 operands.
    batch, seq, K, N = 2, 8, 32, 32
    x = jax.random.normal(kx, (batch, seq, K), dtype=jnp.float32)
    w_l, b_l, w_r, b_r = make_params(K, N)
    p = glu_prepare_params(w_l, b_l, w_r, b_r)
    out = jax.block_until_ready(glu_forward(x, p))
    ref = _reference(x, w_l, b_l, w_r, b_r)
    assert out.shape == (batch, seq, N), out.shape
    assert jnp.allclose(out, ref, atol=1e-2, rtol=1e-2), "case 1 mismatch"

    # Case 2: fused single-matmul path (N = 128, lane-aligned split), f32.
    N2 = 128
    w_l2, b_l2, w_r2, b_r2 = make_params(K, N2)
    p2 = glu_prepare_params(w_l2, b_l2, w_r2, b_r2)
    out2 = jax.block_until_ready(glu_forward(x, p2))
    ref2 = _reference(x, w_l2, b_l2, w_r2, b_r2)
    assert out2.shape == (batch, seq, N2), out2.shape
    assert jnp.allclose(out2, ref2, atol=1e-2, rtol=1e-2), "case 2 mismatch"

    # Case 3: bf16 MXU operands (weights pre-cast once, x cast in-kernel) and
    # a ragged row count (M = 14 -> full-dim row block, no wrapper-side pad).
    p3 = glu_prepare_params(w_l2, b_l2, w_r2, b_r2, compute_dtype=jnp.bfloat16)
    x3 = jax.random.normal(kx2, (batch, 7, K), dtype=jnp.float32)
    out3 = jax.block_until_ready(glu_forward(x3, p3))
    ref3 = _reference(x3, w_l2, b_l2, w_r2, b_r2)
    assert out3.shape == (batch, 7, N2), out3.shape
    assert out3.dtype == x3.dtype
    assert jnp.allclose(out3, ref3, atol=5e-2, rtol=5e-2), "case 3 mismatch"

    print("KERNEL_OK")
</pallas_src>

<mosaic_0001>
module attributes {stable_mosaic.version = 11 : i64} {
  func.func @_glu_kernel_split(%arg0: i32, %arg1: i32, %arg2: memref<16x32xf32, #tpu.memory_space<vmem>>, %arg3: memref<32x32xf32, #tpu.memory_space<vmem>>, %arg4: memref<1x32xf32, #tpu.memory_space<vmem>>, %arg5: memref<32x32xf32, #tpu.memory_space<vmem>>, %arg6: memref<1x32xf32, #tpu.memory_space<vmem>>, %arg7: memref<16x32xf32, #tpu.memory_space<vmem>>) attributes {dimension_semantics = [#tpu.dimension_semantics<parallel>, #tpu.dimension_semantics<parallel>], iteration_bounds = array<i64: 1, 1>, scalar_prefetch = 0 : i64, scratch_operands = 0 : i64, tpu.core_type = #tpu.core_type<tc>, window_params = [{transform_indices = @transform_0, window_bounds = array<i64: 16, 32>}, {pipeline_mode = #tpu.pipeline_mode<synchronous>, transform_indices = @transform_1, window_bounds = array<i64: 32, 32>}, {pipeline_mode = #tpu.pipeline_mode<synchronous>, transform_indices = @transform_2, window_bounds = array<i64: 1, 32>}, {pipeline_mode = #tpu.pipeline_mode<synchronous>, transform_indices = @transform_3, window_bounds = array<i64: 32, 32>}, {pipeline_mode = #tpu.pipeline_mode<synchronous>, transform_indices = @transform_4, window_bounds = array<i64: 1, 32>}, {transform_indices = @transform_5, window_bounds = array<i64: 16, 32>}]} {
    %c0 = arith.constant 0 : index
    %c0_0 = arith.constant 0 : index
    %0 = vector.load %arg2[%c0, %c0_0] : memref<16x32xf32, #tpu.memory_space<vmem>>, vector<16x32xf32>
    %c0_1 = arith.constant 0 : index
    %c0_2 = arith.constant 0 : index
    %1 = vector.load %arg3[%c0_1, %c0_2] : memref<32x32xf32, #tpu.memory_space<vmem>>, vector<32x32xf32>
    %cst = arith.constant dense<0.000000e+00> : vector<16x32xf32>
    %2 = tpu.matmul %0, %1, %cst {dimension_numbers = #tpu.dot_dimension_numbers<[1], [0], [0], [1], [0, 0, 1, 1], [], []>} : vector<16x32xf32>, vector<32x32xf32>, vector<16x32xf32> -> vector<16x32xf32>
    %c0_3 = arith.constant 0 : index
    %c0_4 = arith.constant 0 : index
    %3 = vector.load %arg4[%c0_3, %c0_4] : memref<1x32xf32, #tpu.memory_space<vmem>>, vector<1x32xf32>
    %4 = vector.broadcast %3 : vector<1x32xf32> to vector<16x32xf32>
    %5 = arith.addf %2, %4 : vector<16x32xf32>
    %c0_5 = arith.constant 0 : index
    %c0_6 = arith.constant 0 : index
    %6 = vector.load %arg5[%c0_5, %c0_6] : memref<32x32xf32, #tpu.memory_space<vmem>>, vector<32x32xf32>
    %cst_7 = arith.constant dense<0.000000e+00> : vector<16x32xf32>
    %7 = tpu.matmul %0, %6, %cst_7 {dimension_numbers = #tpu.dot_dimension_numbers<[1], [0], [0], [1], [0, 0, 1, 1], [], []>} : vector<16x32xf32>, vector<32x32xf32>, vector<16x32xf32> -> vector<16x32xf32>
    %c0_8 = arith.constant 0 : index
    %c0_9 = arith.constant 0 : index
    %8 = vector.load %arg6[%c0_8, %c0_9] : memref<1x32xf32, #tpu.memory_space<vmem>>, vector<1x32xf32>
    %9 = vector.broadcast %8 : vector<1x32xf32> to vector<16x32xf32>
    %10 = arith.addf %7, %9 : vector<16x32xf32>
    %cst_10 = arith.constant 5.000000e-01 : f32
    %11 = vector.broadcast %cst_10 : f32 to vector<16x32xf32>
    %12 = arith.mulf %11, %10 : vector<16x32xf32>
    %13 = math.tanh %12 : vector<16x32xf32>
    %cst_11 = arith.constant 5.000000e-01 : f32
    %14 = vector.broadcast %cst_11 : f32 to vector<16x32xf32>
    %15 = arith.mulf %14, %13 : vector<16x32xf32>
    %cst_12 = arith.constant 5.000000e-01 : f32
    %16 = vector.broadcast %cst_12 : f32 to vector<16x32xf32>
    %17 = arith.addf %15, %16 : vector<16x32xf32>
    %18 = arith.mulf %5, %17 : vector<16x32xf32>
    %c0_13 = arith.constant 0 : index
    %c0_14 = arith.constant 0 : index
    %19 = vector.load %arg7[%c0_13, %c0_14] : memref<16x32xf32, #tpu.memory_space<vmem>>, vector<16x32xf32>
    tpu.vector_store %arg7[%c0_13, %c0_14], %18 {strides = array<i32>} : memref<16x32xf32, #tpu.memory_space<vmem>>, vector<16x32xf32>,
    return
  }
  func.func @transform_0(%arg0: i32, %arg1: i32) -> (i32, i32) {
    %c0_i32 = arith.constant 0 : i32
    %c0_i32_0 = arith.constant 0 : i32
    return %arg1, %c0_i32 : i32, i32
  }
  func.func @transform_1(%arg0: i32, %arg1: i32) -> (i32, i32) {
    %c0_i32 = arith.constant 0 : i32
    %c0_i32_0 = arith.constant 0 : i32
    return %c0_i32, %arg0 : i32, i32
  }
  func.func @transform_2(%arg0: i32, %arg1: i32) -> (i32, i32) {
    %c0_i32 = arith.constant 0 : i32
    %c0_i32_0 = arith.constant 0 : i32
    return %c0_i32, %arg0 : i32, i32
  }
  func.func @transform_3(%arg0: i32, %arg1: i32) -> (i32, i32) {
    %c0_i32 = arith.constant 0 : i32
    %c0_i32_0 = arith.constant 0 : i32
    return %c0_i32, %arg0 : i32, i32
  }
  func.func @transform_4(%arg0: i32, %arg1: i32) -> (i32, i32) {
    %c0_i32 = arith.constant 0 : i32
    %c0_i32_0 = arith.constant 0 : i32
    return %c0_i32, %arg0 : i32, i32
  }
  func.func @transform_5(%arg0: i32, %arg1: i32) -> (i32, i32) {
    %c0_i32 = arith.constant 0 : i32
    return %arg1, %arg0 : i32, i32
  }
}

module attributes {stable_mosaic.version = 11 : i64} {
  func.func @_glu_kernel_split(%arg0: i32, %arg1: i32, %arg2: memref<16x32xf32, #tpu.memory_space<vmem>>, %arg3: memref<32x32xf32, #tpu.memory_space<vmem>>, %arg4: memref<1x32xf32, #tpu.memory_space<vmem>>, %arg5: memref<32x32xf32, #tpu.memory_space<vmem>>, %arg6: memref<1x32xf32, #tpu.memory_space<vmem>>, %arg7: memref<16x32xf32, #tpu.memory_space<vmem>>) attributes {dimension_semantics = [#tpu.dimension_semantics<parallel>, #tpu.dimension_semantics<parallel>], iteration_bounds = array<i64: 1, 1>, scalar_prefetch = 0 : i64, scratch_operands = 0 : i64, tpu.core_type = #tpu.core_type<tc>, window_params = [{transform_indices = @transform_0, window_bounds = array<i64: 16, 32>}, {transform_indices = @transform_1, window_bounds = array<i64: 32, 32>}, {transform_indices = @transform_2, window_bounds = array<i64: 1, 32>}, {transform_indices = @transform_3, window_bounds = array<i64: 32, 32>}, {transform_indices = @transform_4, window_bounds = array<i64: 1, 32>}, {transform_indices = @transform_5, window_bounds = array<i64: 16, 32>}]} {
    %c0 = arith.constant 0 : index
    %c0_0 = arith.constant 0 : index
    %0 = vector.load %arg2[%c0, %c0_0] : memref<16x32xf32, #tpu.memory_space<vmem>>, vector<16x32xf32>
    %c0_1 = arith.constant 0 : index
    %c0_2 = arith.constant 0 : index
    %1 = vector.load %arg3[%c0_1, %c0_2] : memref<32x32xf32, #tpu.memory_space<vmem>>, vector<32x32xf32>
    %cst = arith.constant dense<0.000000e+00> : vector<16x32xf32>
    %2 = tpu.matmul %0, %1, %cst {dimension_numbers = #tpu.dot_dimension_numbers<[1], [0], [0], [1], [0, 0, 1, 1], [], []>} : vector<16x32xf32>, vector<32x32xf32>, vector<16x32xf32> -> vector<16x32xf32>
    %c0_3 = arith.constant 0 : index
    %c0_4 = arith.constant 0 : index
    %3 = vector.load %arg4[%c0_3, %c0_4] : memref<1x32xf32, #tpu.memory_space<vmem>>, vector<1x32xf32>
    %4 = vector.broadcast %3 : vector<1x32xf32> to vector<16x32xf32>
    %5 = arith.addf %2, %4 : vector<16x32xf32>
    %c0_5 = arith.constant 0 : index
    %c0_6 = arith.constant 0 : index
    %6 = vector.load %arg5[%c0_5, %c0_6] : memref<32x32xf32, #tpu.memory_space<vmem>>, vector<32x32xf32>
    %cst_7 = arith.constant dense<0.000000e+00> : vector<16x32xf32>
    %7 = tpu.matmul %0, %6, %cst_7 {dimension_numbers = #tpu.dot_dimension_numbers<[1], [0], [0], [1], [0, 0, 1, 1], [], []>} : vector<16x32xf32>, vector<32x32xf32>, vector<16x32xf32> -> vector<16x32xf32>
    %c0_8 = arith.constant 0 : index
    %c0_9 = arith.constant 0 : index
    %8 = vector.load %arg6[%c0_8, %c0_9] : memref<1x32xf32, #tpu.memory_space<vmem>>, vector<1x32xf32>
    %9 = vector.broadcast %8 : vector<1x32xf32> to vector<16x32xf32>
    %10 = arith.addf %7, %9 : vector<16x32xf32>
    %cst_10 = arith.constant 5.000000e-01 : f32
    %11 = vector.broadcast %cst_10 : f32 to vector<16x32xf32>
    %12 = arith.mulf %11, %10 : vector<16x32xf32>
    %13 = math.tanh %12 : vector<16x32xf32>
    %cst_11 = arith.constant 5.000000e-01 : f32
    %14 = vector.broadcast %cst_11 : f32 to vector<16x32xf32>
    %15 = arith.mulf %14, %13 : vector<16x32xf32>
    %cst_12 = arith.constant 5.000000e-01 : f32
    %16 = vector.broadcast %cst_12 : f32 to vector<16x32xf32>
    %17 = arith.addf %15, %16 : vector<16x32xf32>
    %18 = arith.mulf %5, %17 : vector<16x32xf32>
    %c0_13 = arith.constant 0 : index
    %c0_14 = arith.constant 0 : index
    %19 = vector.load %arg7[%c0_13, %c0_14] : memref<16x32xf32, #tpu.memory_space<vmem>>, vector<16x32xf32>
    tpu.vector_store %arg7[%c0_13, %c0_14], %18 {strides = array<i32>} : memref<16x32xf32, #tpu.memory_space<vmem>>, vector<16x32xf32>,
    return
  }
  func.func @transform_0(%arg0: i32, %arg1: i32) -> (i32, i32) {
    %c0_i32 = arith.constant 0 : i32
    %c0_i32_0 = arith.constant 0 : i32
    return %arg1, %c0_i32 : i32, i32
  }
  func.func @transform_1(%arg0: i32, %arg1: i32) -> (i32, i32) {
    %c0_i32 = arith.constant 0 : i32
    %c0_i32_0 = arith.constant 0 : i32
    return %c0_i32, %arg0 : i32, i32
  }
  func.func @transform_2(%arg0: i32, %arg1: i32) -> (i32, i32) {
    %c0_i32 = arith.constant 0 : i32
    %c0_i32_0 = arith.constant 0 : i32
    return %c0_i32, %arg0 : i32, i32
  }
  func.func @transform_3(%arg0: i32, %arg1: i32) -> (i32, i32) {
    %c0_i32 = arith.constant 0 : i32
    %c0_i32_0 = arith.constant 0 : i32
    return %c0_i32, %arg0 : i32, i32
  }
  func.func @transform_4(%arg0: i32, %arg1: i32) -> (i32, i32) {
    %c0_i32 = arith.constant 0 : i32
    %c0_i32_0 = arith.constant 0 : i32
    return %c0_i32, %arg0 : i32, i32
  }
  func.func @transform_5(%arg0: i32, %arg1: i32) -> (i32, i32) {
    %c0_i32 = arith.constant 0 : i32
    return %arg1, %arg0 : i32, i32
  }
}

</mosaic_0001>

<bundles_post_ra>
// kernel: tpu_custom_call.1
= control target key start
LH: loop header
LB: loop body
LE: loop exit
PB: predicated region body
PF: predicated region fallthrough
CT: control target
= control target key end

     0   :  { %10 = vsyncpa [#allocation3], 0  ;;  %s548_s0 = inlined_call_operand.hbm [shape: f32[16,32], index: 0, kind: input, shape index: {}]   ;;  %s549_s1 = inlined_call_operand.hbm [shape: f32[32,32], index: 1, kind: input, shape index: {}]   ;;  %s550_s2 = inlined_call_operand.vmem [shape: f32[1,32], index: 2, kind: input, shape index: {}]   ;;  %s551_s3 = inlined_call_operand.hbm [shape: f32[32,32], index: 3, kind: input, shape index: {}]   ;;  %s552_s4 = inlined_call_operand.vmem [shape: f32[1,32], index: 4, kind: input, shape index: {}]   ;;  %s553_s5 = inlined_call_operand.hbm [shape: f32[16,32], index: 5, kind: output, shape index: {}]  }
   0x1   :  { %11 = vsyncpa [#allocation6], 0 }
   0x2   :  { %12 = vsyncpa [#allocation4], 0  ;;  %s433_s18 = smov [#allocation5]   ;;  %s434_s20 = smov [#allocation2]  }
   0x3   :  { %s30_s19 = sshll.u32 %s433_s18, 4  ;;  %s18_s21 = sshll.u32 %s434_s20, 4  ;;  %s31_s19 = int_to_ptr.vmem [resolvable:$true] %s30_s19  ;;  %s469_s21 = int_to_ptr.vmem [resolvable:$true] %s18_s21 }
   0x4   :  { %s339_s24 = scalar_lea.hbm %s549_s1, 512 }
   0x5   :  { %p340_p0 = scmp.ne.s32.totalorder %s549_s1, %s339_s24  ;;  %p343_p1 = scmp.lt.u32.totalorder %s339_s24, %s549_s1 }
   0x7   :  { %p345_p2 = pnand %p343_p1, %p340_p0 }
   0x9   :  { %348 = shalt.err (!%p345_p2)
}
   0xa   :  { %s349_s29 = scalar_lea.vmem %s31_s19, 512  ;;  %p354_p4 = scmp.lt.s32.totalorder %s31_s19, %s31_s19 }
   0xb   :  { %p350_p3 = scmp.ne.s32.totalorder %s31_s19, %s349_s29  ;;  %p355_p5 = scmp.lt.s32.totalorder %s349_s29, %s349_s29 }
   0xd   :  { %p356_p6 = por %p355_p5, %p354_p4 }
   0xf   :  { %p357_p7 = pnand %p356_p6, %p350_p3 }
  0x11   :  { %360 = shalt.err (!%p357_p7)
}
  0x12   :  { %s435_s30 = smov 128   ;;  %s436_s6 = smov 8  }
  0x13   :  { %36 = dma.hbm_to_vmem [thread:$0]  %s549_s1, 512, %s31_s19, [#allocation6], %s435_s30, %s435_s30, %s436_s6  }
  0x14   :  { %s361_s11 = scalar_lea.hbm %s548_s0, 256 }
  0x15   :  { %p362_p8 = scmp.ne.s32.totalorder %s548_s0, %s361_s11  ;;  %p365_p9 = scmp.lt.u32.totalorder %s361_s11, %s548_s0 }
  0x17   :  { %p367_p10 = pnand %p365_p9, %p362_p8 }
  0x19   :  { %370 = shalt.err (!%p367_p10)
}
  0x1a   :  { %s371_s16 = scalar_lea.vmem %s469_s21, 256  ;;  %p376_p12 = scmp.lt.s32.totalorder %s469_s21, %s469_s21 }
  0x1b   :  { %p372_p11 = scmp.ne.s32.totalorder %s469_s21, %s371_s16  ;;  %p377_p13 = scmp.lt.s32.totalorder %s371_s16, %s371_s16 }
  0x1d   :  { %p378_p0 = por %p377_p13, %p376_p12 }
  0x1f   :  { %p379_p1 = pnand %p378_p0, %p372_p11 }
  0x21   :  { %382 = shalt.err (!%p379_p1)
}
  0x22   :  { %24 = dma.hbm_to_vmem [thread:$0]  %s548_s0, 256, %s469_s21, [#allocation3], %s435_s30, %s435_s30, %s436_s6  }
  0x23   :  { %s437_s18 = smov [#allocation7]   ;;  %s383_s23 = scalar_lea.hbm %s551_s3, 512 }
  0x24   :  { %s44_s19 = sshll.u32 %s437_s18, 4  ;;  %p384_p2 = scmp.ne.s32.totalorder %s551_s3, %s383_s23  ;;  %s45_s19 = int_to_ptr.vmem [resolvable:$true] %s44_s19 }
  0x25   :  { %p387_p3 = scmp.lt.u32.totalorder %s383_s23, %s551_s3 }
  0x27   :  { %p389_p4 = pnand %p387_p3, %p384_p2 }
  0x29   :  { %392 = shalt.err (!%p389_p4)
}
  0x2a   :  { %s393_s28 = scalar_lea.vmem %s45_s19, 512  ;;  %p398_p6 = scmp.lt.s32.totalorder %s45_s19, %s45_s19 }
  0x2b   :  { %p394_p5 = scmp.ne.s32.totalorder %s45_s19, %s393_s28  ;;  %p399_p7 = scmp.lt.s32.totalorder %s393_s28, %s393_s28 }
  0x2d   :  { %p400_p8 = por %p399_p7, %p398_p6 }
  0x2f   :  { %p401_p9 = pnand %p400_p8, %p394_p5 }
  0x31   :  { %404 = shalt.err (!%p401_p9)
}
  0x32   :  { %50 = dma.hbm_to_vmem [thread:$0]  %s551_s3, 512, %s45_s19, [#allocation6], %s435_s30, %s435_s30, %s436_s6  }
  0x33   :  { %427 = dma.done.wait [#allocation3], 256  }
  0x34   :  { %428 = vsyncadd [#allocation3], 4294967040 }
  0x35   :  { %429 = dma.done.wait [#allocation6], 1024  }
  0x36   :  { %430 = vsyncadd [#allocation6], 4294966272  ;;  %vm75_vm0 = vcmask 261120   ;;  %v157_v0 = vld [vmem:[#allocation7] sm:$0xff]  ;;  %v158_v1 = vld [vmem:[#allocation7 + $0x8] sm:$0xff] }
  0x37   :  { %v159_v2 = vld [vmem:[#allocation7 + $0x10] sm:$0xff]  ;;  %v321_v3 = vpack.c.bf16 %v158_v1, %v157_v0  ;;  %v160_v4 = vld [vmem:[#allocation7 + $0x18] sm:$0xff]  ;;  %v64_v7 = vld [vmem:[#allocation5] sm:$0xff] }
  0x38   :  { %v62_v5 = vld [vmem:[#allocation2] sm:$0xff]  ;;  %v325_v6 = vpack.c.bf16 %v160_v4, %v159_v2  ;;  %v65_v8 = vld [vmem:[#allocation5 + $0x8] sm:$0xff]  ;;  %v67_v11 = vld [vmem:[#allocation5 + $0x18] sm:$0xff] }
  0x39   :  { %310 = vmatprep.mubr.msk.f32.mxu1 %vm75_vm0, %v62_v5  ;;  %v66_v9 = vld [vmem:[#allocation5 + $0x10] sm:$0xff]  ;;  %299 = vmatprep.mubr.msk.f32.mxu0 %vm75_vm0, %v62_v5  ;;  %v313_v10 = vpack.c.bf16 %v65_v8, %v64_v7  ;;  %v63_v13 = vld [vmem:[#allocation2 + $0x8] sm:$0xff] }
  0x3a   :  { %322 = vmatprep.subr.bf16.mxu1 %v321_v3  ;;  %v317_v12 = vpack.c.bf16 %v67_v11, %v66_v9  ;;  %v276_v14 = vld [vmem:[%s552_s4] ss:$0 sm:$0xff]  ;;  %s438_s4 = smov [#allocation8]  }
  0x3b   :  { %324 = vmatpush3.bf16.msra.mxu1 %v321_v3  ;;  %314 = vmatprep.subr.bf16.mxu0 %v313_v10  ;;  %v273_v23 = vld [vmem:[%s550_s2] ss:$0 sm:$0xff]  ;;  %s260_s9 = sshll.u32 %s438_s4, 4  ;;  %s261_s9 = int_to_ptr.vmem [resolvable:$true] %s260_s9 }
  0x3c   :  { %326 = vmatprep.subr.bf16.mxu1 %v325_v6  ;;  %316 = vmatpush3.bf16.msra.mxu0 %v313_v10  ;;  %s405_s10 = scalar_lea.vmem %s261_s9, 256  ;;  %p410_p11 = scmp.lt.s32.totalorder %s261_s9, %s261_s9 }
  0x3d   :  { %318 = vmatprep.subr.bf16.mxu0 %v317_v12  ;;  %p406_p10 = scmp.ne.s32.totalorder %s261_s9, %s405_s10  ;;  %p411_p12 = scmp.lt.s32.totalorder %s405_s10, %s405_s10 }
  0x3f   :  { %328 = vmatpush3.bf16.msra.mxu1 %v325_v6  ;;  %p412_p13 = por %p411_p12, %p410_p11 }
  0x40   :  { %320 = vmatpush3.bf16.msra.mxu0 %v317_v12 }
  0x41   :  { %p413_p0 = pnand %p412_p13, %p406_p10 }
  0x42   :  { %311 = vmatmul.mubr.msk.f32.vlgmr.msra.gmra.mrb[0].mxu1 %vm75_vm0, %v63_v13 }
  0x43   :  { %300 = vmatmul.mubr.msk.f32.vlgmr.msra.gmra.mrb[0].mxu0 %vm75_vm0, %v63_v13 }
 0x115   :  { %v312_v15 = vpop.f32.mrb[0].mxu1 }
 0x116   :  { %v240_v16 = vadd.f32 %v312_v15, %v276_v14  ;;  %v234_v17 = vpop.f32.mrb[1].mxu1  ;;  %v301_v19 = vpop.f32.mrb[0].mxu0 }
 0x117   :  { %v235_v18 = vadd.f32 %v276_v14, %v234_v17  ;;  %v148_v21 = vpop.f32.mrb[1].mxu0  ;;  %v154_v27 = vadd.f32 %v301_v19, %v273_v23 }
 0x118   :  { %v244_v20 = vmul.f32 0.5, %v240_v16  ;;  %v149_v29 = vadd.f32 %v273_v23, %v148_v21 }
 0x119   :  { %v243_v22 = vmul.f32 0.5, %v235_v18 }
 0x11a   :  { %335 = vtanh.f32 %v244_v20 }
 0x11b   :  { %337 = vtanh.f32 %v243_v22 }
 0x124   :  { %v336_v24 = vpop.eup %335 }
 0x125   :  { %v338_v25 = vpop.eup %337  ;;  %v248_v26 = vmul.f32 0.5, %v336_v24 }
 0x126   :  { %v247_v28 = vmul.f32 0.5, %v338_v25 }
 0x127   :  { %v250_v30 = vadd.f32 0.5, %v248_v26 }
 0x128   :  { %v249_v31 = vadd.f32 0.5, %v247_v28 }
 0x129   :  { %v252_v32 = vmul.f32 %v250_v30, %v154_v27 }
 0x12a   :  { %v251_v33 = vmul.f32 %v249_v31, %v149_v29 }
 0x12b   :  { %254 = vst.msk [vmem:[#allocation8 + $0x8] sm:$0xff] %vm75_vm0, %v252_v32 }
 0x12c   :  { %253 = vst.msk [vmem:[#allocation8] sm:$0xff] %vm75_vm0, %v251_v33 }
 0x12d   :  { %416 = shalt.err (!%p413_p0)
}
 0x12e   :  { %s417_s12 = scalar_lea.hbm %s553_s5, 256 }
 0x12f   :  { %p418_p1 = scmp.ne.s32.totalorder %s553_s5, %s417_s12  ;;  %p421_p2 = scmp.lt.u32.totalorder %s417_s12, %s553_s5 }
 0x131   :  { %p423_p3 = pnand %p421_p2, %p418_p1 }
 0x133   :  { %426 = shalt.err (!%p423_p3)
}
 0x134   :  { %266 = dma.vmem_to_hbm [thread:$0]  %s261_s9, 256, %s553_s5, [#allocation4], %s435_s30, %s435_s30, %s436_s6  }
 0x135   :  { %431 = dma.done.wait [#allocation4], 256  }
 0x136   :  { %432 = vsyncadd [#allocation4], 4294967040 }
 0x137   :  { %270 = vsyncpa [#allocation3], 1 }
 0x138   :  { %271 = vsyncpa [#allocation6], 1 }
 0x139   :  { %272 = vsyncpa [#allocation4], 1 }

// kernel: tpu_custom_call.1
= control target key start
LH: loop header
LB: loop body
LE: loop exit
PB: predicated region body
PF: predicated region fallthrough
CT: control target
= control target key end

     0   :  { %10 = vsyncpa [#allocation3], 0  ;;  %s548_s0 = inlined_call_operand.hbm [shape: f32[16,32], index: 0, kind: input, shape index: {}]   ;;  %s549_s1 = inlined_call_operand.hbm [shape: f32[32,32], index: 1, kind: input, shape index: {}]   ;;  %s550_s2 = inlined_call_operand.vmem [shape: f32[1,32], index: 2, kind: input, shape index: {}]   ;;  %s551_s3 = inlined_call_operand.hbm [shape: f32[32,32], index: 3, kind: input, shape index: {}]   ;;  %s552_s4 = inlined_call_operand.vmem [shape: f32[1,32], index: 4, kind: input, shape index: {}]   ;;  %s553_s5 = inlined_call_operand.hbm [shape: f32[16,32], index: 5, kind: output, shape index: {}]  }
   0x1   :  { %11 = vsyncpa [#allocation6], 0 }
   0x2   :  { %12 = vsyncpa [#allocation4], 0  ;;  %s433_s18 = smov [#allocation5]   ;;  %s434_s20 = smov [#allocation2]  }
   0x3   :  { %s30_s19 = sshll.u32 %s433_s18, 4  ;;  %s18_s21 = sshll.u32 %s434_s20, 4  ;;  %s31_s19 = int_to_ptr.vmem [resolvable:$true] %s30_s19  ;;  %s469_s21 = int_to_ptr.vmem [resolvable:$true] %s18_s21 }
   0x4   :  { %s339_s24 = scalar_lea.hbm %s549_s1, 512 }
   0x5   :  { %p340_p0 = scmp.ne.s32.totalorder %s549_s1, %s339_s24  ;;  %p343_p1 = scmp.lt.u32.totalorder %s339_s24, %s549_s1 }
   0x7   :  { %p345_p2 = pnand %p343_p1, %p340_p0 }
   0x9   :  { %348 = shalt.err (!%p345_p2)
}
   0xa   :  { %s349_s29 = scalar_lea.vmem %s31_s19, 512  ;;  %p354_p4 = scmp.lt.s32.totalorder %s31_s19, %s31_s19 }
   0xb   :  { %p350_p3 = scmp.ne.s32.totalorder %s31_s19, %s349_s29  ;;  %p355_p5 = scmp.lt.s32.totalorder %s349_s29, %s349_s29 }
   0xd   :  { %p356_p6 = por %p355_p5, %p354_p4 }
   0xf   :  { %p357_p7 = pnand %p356_p6, %p350_p3 }
  0x11   :  { %360 = shalt.err (!%p357_p7)
}
  0x12   :  { %s435_s30 = smov 128   ;;  %s436_s6 = smov 8  }
  0x13   :  { %36 = dma.hbm_to_vmem [thread:$0]  %s549_s1, 512, %s31_s19, [#allocation6], %s435_s30, %s435_s30, %s436_s6  }
  0x14   :  { %s361_s11 = scalar_lea.hbm %s548_s0, 256 }
  0x15   :  { %p362_p8 = scmp.ne.s32.totalorder %s548_s0, %s361_s11  ;;  %p365_p9 = scmp.lt.u32.totalorder %s361_s11, %s548_s0 }
  0x17   :  { %p367_p10 = pnand %p365_p9, %p362_p8 }
  0x19   :  { %370 = shalt.err (!%p367_p10)
}
  0x1a   :  { %s371_s16 = scalar_lea.vmem %s469_s21, 256  ;;  %p376_p12 = scmp.lt.s32.totalorder %s469_s21, %s469_s21 }
  0x1b   :  { %p372_p11 = scmp.ne.s32.totalorder %s469_s21, %s371_s16  ;;  %p377_p13 = scmp.lt.s32.totalorder %s371_s16, %s371_s16 }
  0x1d   :  { %p378_p0 = por %p377_p13, %p376_p12 }
  0x1f   :  { %p379_p1 = pnand %p378_p0, %p372_p11 }
  0x21   :  { %382 = shalt.err (!%p379_p1)
}
  0x22   :  { %24 = dma.hbm_to_vmem [thread:$0]  %s548_s0, 256, %s469_s21, [#allocation3], %s435_s30, %s435_s30, %s436_s6  }
  0x23   :  { %s437_s18 = smov [#allocation7]   ;;  %s383_s23 = scalar_lea.hbm %s551_s3, 512 }
  0x24   :  { %s44_s19 = sshll.u32 %s437_s18, 4  ;;  %p384_p2 = scmp.ne.s32.totalorder %s551_s3, %s383_s23  ;;  %s45_s19 = int_to_ptr.vmem [resolvable:$true] %s44_s19 }
  0x25   :  { %p387_p3 = scmp.lt.u32.totalorder %s383_s23, %s551_s3 }
  0x27   :  { %p389_p4 = pnand %p387_p3, %p384_p2 }
  0x29   :  { %392 = shalt.err (!%p389_p4)
}
  0x2a   :  { %s393_s28 = scalar_lea.vmem %s45_s19, 512  ;;  %p398_p6 = scmp.lt.s32.totalorder %s45_s19, %s45_s19 }
  0x2b   :  { %p394_p5 = scmp.ne.s32.totalorder %s45_s19, %s393_s28  ;;  %p399_p7 = scmp.lt.s32.totalorder %s393_s28, %s393_s28 }
  0x2d   :  { %p400_p8 = por %p399_p7, %p398_p6 }
  0x2f   :  { %p401_p9 = pnand %p400_p8, %p394_p5 }
  0x31   :  { %404 = shalt.err (!%p401_p9)
}
  0x32   :  { %50 = dma.hbm_to_vmem [thread:$0]  %s551_s3, 512, %s45_s19, [#allocation6], %s435_s30, %s435_s30, %s436_s6  }
  0x33   :  { %427 = dma.done.wait [#allocation3], 256  }
  0x34   :  { %428 = vsyncadd [#allocation3], 4294967040 }
  0x35   :  { %429 = dma.done.wait [#allocation6], 1024  }
  0x36   :  { %430 = vsyncadd [#allocation6], 4294966272  ;;  %vm75_vm0 = vcmask 261120   ;;  %v157_v0 = vld [vmem:[#allocation7] sm:$0xff]  ;;  %v158_v1 = vld [vmem:[#allocation7 + $0x8] sm:$0xff] }
  0x37   :  { %v159_v2 = vld [vmem:[#allocation7 + $0x10] sm:$0xff]  ;;  %v321_v3 = vpack.c.bf16 %v158_v1, %v157_v0  ;;  %v160_v4 = vld [vmem:[#allocation7 + $0x18] sm:$0xff]  ;;  %v64_v7 = vld [vmem:[#allocation5] sm:$0xff] }
  0x38   :  { %v62_v5 = vld [vmem:[#allocation2] sm:$0xff]  ;;  %v325_v6 = vpack.c.bf16 %v160_v4, %v159_v2  ;;  %v65_v8 = vld [vmem:[#allocation5 + $0x8] sm:$0xff]  ;;  %v67_v11 = vld [vmem:[#allocation5 + $0x18] sm:$0xff] }
  0x39   :  { %310 = vmatprep.mubr.msk.f32.mxu1 %vm75_vm0, %v62_v5  ;;  %v66_v9 = vld [vmem:[#allocation5 + $0x10] sm:$0xff]  ;;  %299 = vmatprep.mubr.msk.f32.mxu0 %vm75_vm0, %v62_v5  ;;  %v313_v10 = vpack.c.bf16 %v65_v8, %v64_v7  ;;  %v63_v13 = vld [vmem:[#allocation2 + $0x8] sm:$0xff] }
  0x3a   :  { %322 = vmatprep.subr.bf16.mxu1 %v321_v3  ;;  %v317_v12 = vpack.c.bf16 %v67_v11, %v66_v9  ;;  %v276_v14 = vld [vmem:[%s552_s4] ss:$0 sm:$0xff]  ;;  %s438_s4 = smov [#allocation8]  }
  0x3b   :  { %324 = vmatpush3.bf16.msra.mxu1 %v321_v3  ;;  %314 = vmatprep.subr.bf16.mxu0 %v313_v10  ;;  %v273_v23 = vld [vmem:[%s550_s2] ss:$0 sm:$0xff]  ;;  %s260_s9 = sshll.u32 %s438_s4, 4  ;;  %s261_s9 = int_to_ptr.vmem [resolvable:$true] %s260_s9 }
  0x3c   :  { %326 = vmatprep.subr.bf16.mxu1 %v325_v6  ;;  %316 = vmatpush3.bf16.msra.mxu0 %v313_v10  ;;  %s405_s10 = scalar_lea.vmem %s261_s9, 256  ;;  %p410_p11 = scmp.lt.s32.totalorder %s261_s9, %s261_s9 }
  0x3d   :  { %318 = vmatprep.subr.bf16.mxu0 %v317_v12  ;;  %p406_p10 = scmp.ne.s32.totalorder %s261_s9, %s405_s10  ;;  %p411_p12 = scmp.lt.s32.totalorder %s405_s10, %s405_s10 }
  0x3f   :  { %328 = vmatpush3.bf16.msra.mxu1 %v325_v6  ;;  %p412_p13 = por %p411_p12, %p410_p11 }
  0x40   :  { %320 = vmatpush3.bf16.msra.mxu0 %v317_v12 }
  0x41   :  { %p413_p0 = pnand %p412_p13, %p406_p10 }
  0x42   :  { %311 = vmatmul.mubr.msk.f32.vlgmr.msra.gmra.mrb[0].mxu1 %vm75_vm0, %v63_v13 }
  0x43   :  { %300 = vmatmul.mubr.msk.f32.vlgmr.msra.gmra.mrb[0].mxu0 %vm75_vm0, %v63_v13 }
 0x115   :  { %v312_v15 = vpop.f32.mrb[0].mxu1 }
 0x116   :  { %v240_v16 = vadd.f32 %v312_v15, %v276_v14  ;;  %v234_v17 = vpop.f32.mrb[1].mxu1  ;;  %v301_v19 = vpop.f32.mrb[0].mxu0 }
 0x117   :  { %v235_v18 = vadd.f32 %v276_v14, %v234_v17  ;;  %v148_v21 = vpop.f32.mrb[1].mxu0  ;;  %v154_v27 = vadd.f32 %v301_v19, %v273_v23 }
 0x118   :  { %v244_v20 = vmul.f32 0.5, %v240_v16  ;;  %v149_v29 = vadd.f32 %v273_v23, %v148_v21 }
 0x119   :  { %v243_v22 = vmul.f32 0.5, %v235_v18 }
 0x11a   :  { %335 = vtanh.f32 %v244_v20 }
 0x11b   :  { %337 = vtanh.f32 %v243_v22 }
 0x124   :  { %v336_v24 = vpop.eup %335 }
 0x125   :  { %v338_v25 = vpop.eup %337  ;;  %v248_v26 = vmul.f32 0.5, %v336_v24 }
 0x126   :  { %v247_v28 = vmul.f32 0.5, %v338_v25 }
 0x127   :  { %v250_v30 = vadd.f32 0.5, %v248_v26 }
 0x128   :  { %v249_v31 = vadd.f32 0.5, %v247_v28 }
 0x129   :  { %v252_v32 = vmul.f32 %v250_v30, %v154_v27 }
 0x12a   :  { %v251_v33 = vmul.f32 %v249_v31, %v149_v29 }
 0x12b   :  { %254 = vst.msk [vmem:[#allocation8 + $0x8] sm:$0xff] %vm75_vm0, %v252_v32 }
 0x12c   :  { %253 = vst.msk [vmem:[#allocation8] sm:$0xff] %vm75_vm0, %v251_v33 }
 0x12d   :  { %416 = shalt.err (!%p413_p0)
}
 0x12e   :  { %s417_s12 = scalar_lea.hbm %s553_s5, 256 }
 0x12f   :  { %p418_p1 = scmp.ne.s32.totalorder %s553_s5, %s417_s12  ;;  %p421_p2 = scmp.lt.u32.totalorder %s417_s12, %s553_s5 }
 0x131   :  { %p423_p3 = pnand %p421_p2, %p418_p1 }
 0x133   :  { %426 = shalt.err (!%p423_p3)
}
 0x134   :  { %266 = dma.vmem_to_hbm [thread:$0]  %s261_s9, 256, %s553_s5, [#allocation4], %s435_s30, %s435_s30, %s436_s6  }
 0x135   :  { %431 = dma.done.wait [#allocation4], 256  }
 0x136   :  { %432 = vsyncadd [#allocation4], 4294967040 }
 0x137   :  { %270 = vsyncpa [#allocation3], 1 }
 0x138   :  { %271 = vsyncpa [#allocation6], 1 }
 0x139   :  { %272 = vsyncpa [#allocation4], 1 }

</bundles_post_ra>
